<compile_context>
chip_gen: v7x
topology: tpu7x:2x2x1
jax: 0.10.0
libtpu: 0.0.40
codegen_flags: <defaults>
</compile_context>

<pallas_src>
import functools

import numpy as np
import jax
import jax.numpy as jnp
from jax.experimental import pallas as pl
from jax.experimental.pallas import tpu as pltpu


# Conservative double-buffered VMEM working-set budget: fits v5e's small scoped default once the
# limit is raised, and stays well under half of v7x's 64 MiB physical VMEM per TensorCore.
_VMEM_BUDGET_BYTES = 16 * 1024 * 1024


def _round_up(x, m):
    return (x + m - 1) // m * m


def _vmem_bytes_per_token(num_q_heads, num_k_heads, head_dim, qk_itemsize, cs_itemsize):
    """Per-token VMEM bytes of one pipeline buffer set, including (8,128) tile padding."""
    d_pad = _round_up(head_dim, 128)
    hq_pad = _round_up(num_q_heads, 8)   # head axis sits on sublanes -> padded to 8
    hk_pad = _round_up(num_k_heads, 8)
    qk = (hq_pad + hk_pad) * d_pad * qk_itemsize * 2     # q/k input blocks + aliased output blocks
    cs = 2 * d_pad * cs_itemsize                         # cos_full + sin_full rows (bf16)
    return qk + cs


def _select_t_tile(num_tokens, bytes_per_token, t_tile_max):
    """Pick tokens-per-grid-step from the VMEM budget; keep >=2 steps for v7x megacore."""
    t = _VMEM_BUDGET_BYTES // (2 * bytes_per_token)       # 2x: double-buffered pipeline
    t = min(t, t_tile_max, num_tokens)
    if num_tokens >= 16:
        # Guarantee at least 2 grid steps so the "parallel" token axis can be sharded across
        # both TensorCores on v7x (no-op cost on the single-TC v5e/v6e).
        t = min(t, pl.cdiv(num_tokens, 2))
    t = max(8, (t // 8) * 8)                              # sublane multiple; Pallas clips ragged tail
    return int(t)


def _rope_kernel(q_ref, k_ref, cos_ref, sin_ref, q_out_ref, k_out_ref, *, half_dim):
    """Neox rotary for one tile of tokens, full-lane formulation.

    q_ref  : [T, Hq, D]   (D = 2*half_dim on the lane axis)
    k_ref  : [T, Hk, D]
    cos_ref: [T, D]   bf16  [cos | cos]
    sin_ref: [T, D]   bf16  [-sin | sin]
    """
    cos = cos_ref[...].astype(jnp.float32)[:, None, :]   # [T, 1, D] -> broadcast over heads
    sin = sin_ref[...].astype(jnp.float32)[:, None, :]

    def rotate(x_ref, o_ref):
        x = x_ref[...].astype(jnp.float32)                # [T, H, D]
        # Swap halves per head on the XLU: roll by D/2 -> [x2 | x1].
        x_rot = pltpu.roll(x, shift=half_dim, axis=2)
        # Single lane-dense full-width store (no masked half-lane vst).
        o_ref[...] = (x * cos + x_rot * sin).astype(o_ref.dtype)

    rotate(q_ref, q_out_ref)
    rotate(k_ref, k_out_ref)


def apply_rotary_embedding(positions, query, key, head_dim, cos_sin_cache, t_tile_max=256):
    """Functional equivalent of awq_inference_engine.rotary_embedding(..., is_neox=True).

    Mirrors the CUDA in-place update via input_output_aliases; for the aliasing to actually avoid
    extra HBM buffers the caller must donate query/key (jax.jit(..., donate_argnums=...)).
    For long prefill on v6e, sweeping t_tile_max up to 512 is a small free win.
    """
    num_tokens = positions.shape[0]
    num_q_heads = query.shape[-1] // head_dim
    num_k_heads = key.shape[-1] // head_dim
    assert head_dim % 2 == 0 and cos_sin_cache.shape[-1] == head_dim
    half_dim = head_dim // 2

    # Hoisted per-token gather (plain XLA) + [cos|cos] / [-sin|sin] doubling.  bf16 on the wire;
    # the kernel upcasts to f32 (safe on v5e which has no bf16 VALU).
    cs = jnp.take(cos_sin_cache, positions.astype(jnp.int32), axis=0).astype(jnp.float32)
    cos = cs[:, :half_dim]
    sin = cs[:, half_dim:]
    cos_full = jnp.concatenate([cos, cos], axis=-1).astype(jnp.bfloat16)     # [T, D]
    sin_full = jnp.concatenate([-sin, sin], axis=-1).astype(jnp.bfloat16)    # [T, D]

    # Metadata-only reshapes (row-major layout identical); head_dim stays on the lane axis.
    q3 = query.reshape(num_tokens, num_q_heads, head_dim)
    k3 = key.reshape(num_tokens, num_kv_heads_safe := num_k_heads, head_dim)

    bytes_per_token = _vmem_bytes_per_token(
        num_q_heads, num_k_heads, head_dim, q3.dtype.itemsize, 2)
    t_tile = _select_t_tile(num_tokens, bytes_per_token, t_tile_max)
    footprint = 2 * t_tile * bytes_per_token
    vmem_limit = int(min(64 << 20, max(footprint + (2 << 20), 8 << 20)))
    grid = (pl.cdiv(num_tokens, t_tile),)

    kernel = functools.partial(_rope_kernel, half_dim=half_dim)

    # TODO(synk): for MQA/GQA (num_kv_heads < 8) a 2D [T, Hkv*D] k layout would avoid sublane
    # padding of the head axis; needs per-head-strided roll of cos/sin, left as a follow-up.
    q_out, k_out = pl.pallas_call(
        kernel,
        out_shape=(
            jax.ShapeDtypeStruct(q3.shape, q3.dtype),
            jax.ShapeDtypeStruct(k3.shape, k3.dtype),
        ),
        grid=grid,
        in_specs=[
            pl.BlockSpec((t_tile, num_q_heads, head_dim), lambda i: (i, 0, 0)),   # query
            pl.BlockSpec((t_tile, num_k_heads, head_dim), lambda i: (i, 0, 0)),   # key
            pl.BlockSpec((t_tile, head_dim), lambda i: (i, 0)),                   # cos_full (bf16)
            pl.BlockSpec((t_tile, head_dim), lambda i: (i, 0)),                   # sin_full (bf16)
        ],
        out_specs=(
            pl.BlockSpec((t_tile, num_q_heads, head_dim), lambda i: (i, 0, 0)),
            pl.BlockSpec((t_tile, num_k_heads, head_dim), lambda i: (i, 0, 0)),
        ),
        # Mirror CUDA in-place semantics: reuse the q/k buffers for the outputs.
        input_output_aliases={0: 0, 1: 1},
        compiler_params=pltpu.CompilerParams(
            dimension_semantics=("parallel",),
            vmem_limit_bytes=vmem_limit,
        ),
    )(q3, k3, cos_full, sin_full)

    return q_out.reshape(query.shape), k_out.reshape(key.shape)


class QuantLlamaRotaryEmbeddingPallas:
    """Mirrors QuantLlamaRotaryEmbedding.__init__ / forward (is_neox=True path)."""

    def __init__(self, dim, max_position_embeddings=2048, base=10000):
        self.dim = dim
        self.max_position_embeddings = max_position_embeddings
        self.base = base
        inv_freq = 1.0 / (base ** (jnp.arange(0, dim, 2, dtype=jnp.float32) / dim))
        self.inv_freq = inv_freq
        t = jnp.arange(max_position_embeddings, dtype=jnp.float32)
        freqs = jnp.einsum("i,j->ij", t, inv_freq)                       # [max_pos, dim/2]
        # torch stores cache.half(); the cache never enters the kernel (gather is hoisted), so we
        # keep it float32 for closer numerics.  The per-token slabs go bf16 on the wire.
        self.cos_sin_cache = jnp.concatenate([jnp.cos(freqs), jnp.sin(freqs)], axis=-1)

    def __call__(self, query, key, positions):
        return apply_rotary_embedding(positions, query, key, self.dim, self.cos_sin_cache)


def _reference(positions, query, key, head_dim, cos_sin_cache):
    """Independent plain-JAX neox rotary reference (classic half-slice formulation, f32)."""
    half = head_dim // 2
    cs = jnp.take(cos_sin_cache, positions.astype(jnp.int32), axis=0).astype(jnp.float32)
    cos = cs[:, None, :half]
    sin = cs[:, None, half:]

    def rot(x):
        t = x.shape[0]
        h = x.shape[-1] // head_dim
        x3 = x.reshape(t, h, head_dim).astype(jnp.float32)
        x1, x2 = x3[..., :half], x3[..., half:]
        out = jnp.concatenate([x1 * cos - x2 * sin, x2 * cos + x1 * sin], axis=-1)
        return out.astype(x.dtype).reshape(x.shape)

    return rot(query), rot(key)


if __name__ == "__main__":
    head_dim = 128          # real LLaMA per-head rotary dim -> lane-dense
    max_pos = 64            # small max_position_embeddings for the synthetic test
    num_q_heads = 4
    num_kv_heads = 2

    rope = QuantLlamaRotaryEmbeddingPallas(head_dim, max_position_embeddings=max_pos)

    rng = jax.random.PRNGKey(0)
    # num_tokens=16 -> even tiling across 2 grid steps; num_tokens=12 -> ragged final tile,
    # which exercises partial-block writeback together with input_output_aliases.
    for num_tokens in (16, 12):
        kq, kk, kp, rng = jax.random.split(rng, 4)
        query = jax.random.normal(
            kq, (num_tokens, num_q_heads * head_dim), dtype=jnp.float32).astype(jnp.bfloat16)
        key_t = jax.random.normal(
            kk, (num_tokens, num_kv_heads * head_dim), dtype=jnp.float32).astype(jnp.bfloat16)
        positions = jax.random.randint(kp, (num_tokens,), 0, max_pos, dtype=jnp.int32)

        q_ref, k_ref = _reference(positions, query, key_t, head_dim, rope.cos_sin_cache)

        q_out, k_out = rope(query, key_t, positions)
        jax.block_until_ready((q_out, k_out))

        np.testing.assert_allclose(np.asarray(q_out, dtype=np.float32),
                                   np.asarray(q_ref, dtype=np.float32), atol=3e-2, rtol=3e-2)
        np.testing.assert_allclose(np.asarray(k_out, dtype=np.float32),
                                   np.asarray(k_ref, dtype=np.float32), atol=3e-2, rtol=3e-2)

        assert q_out.shape == query.shape and q_out.dtype == query.dtype
        assert k_out.shape == key_t.shape and k_out.dtype == key_t.dtype

    print("KERNEL_OK")
</pallas_src>

<mosaic_0001>
module attributes {stable_mosaic.version = 11 : i64} {
  func.func @_rope_kernel(%arg0: i32, %arg1: memref<8x4x128xbf16, #tpu.memory_space<vmem>>, %arg2: memref<8x2x128xbf16, #tpu.memory_space<vmem>>, %arg3: memref<8x128xbf16, #tpu.memory_space<vmem>>, %arg4: memref<8x128xbf16, #tpu.memory_space<vmem>>, %arg5: memref<8x4x128xbf16, #tpu.memory_space<vmem>>, %arg6: memref<8x2x128xbf16, #tpu.memory_space<vmem>>) attributes {dimension_semantics = [#tpu.dimension_semantics<parallel>], iteration_bounds = array<i64: 2>, scalar_prefetch = 0 : i64, scratch_operands = 0 : i64, tpu.core_type = #tpu.core_type<tc>, window_params = [{transform_indices = @transform_0, window_bounds = array<i64: 8, 4, 128>}, {transform_indices = @transform_1, window_bounds = array<i64: 8, 2, 128>}, {transform_indices = @transform_2, window_bounds = array<i64: 8, 128>}, {transform_indices = @transform_3, window_bounds = array<i64: 8, 128>}, {transform_indices = @transform_4, window_bounds = array<i64: 8, 4, 128>}, {transform_indices = @transform_5, window_bounds = array<i64: 8, 2, 128>}]} {
    %c0 = arith.constant 0 : index
    %c0_0 = arith.constant 0 : index
    %0 = vector.load %arg3[%c0, %c0_0] : memref<8x128xbf16, #tpu.memory_space<vmem>>, vector<8x128xbf16>
    %1 = arith.extf %0 : vector<8x128xbf16> to vector<8x128xf32>
    %2 = vector.shape_cast %1 : vector<8x128xf32> to vector<8x1x128xf32>
    %c0_1 = arith.constant 0 : index
    %c0_2 = arith.constant 0 : index
    %3 = vector.load %arg4[%c0_1, %c0_2] : memref<8x128xbf16, #tpu.memory_space<vmem>>, vector<8x128xbf16>
    %4 = arith.extf %3 : vector<8x128xbf16> to vector<8x128xf32>
    %5 = vector.shape_cast %4 : vector<8x128xf32> to vector<8x1x128xf32>
    %c0_3 = arith.constant 0 : index
    %c0_4 = arith.constant 0 : index
    %c0_5 = arith.constant 0 : index
    %6 = vector.load %arg1[%c0_3, %c0_4, %c0_5] : memref<8x4x128xbf16, #tpu.memory_space<vmem>>, vector<8x4x128xbf16>
    %7 = arith.extf %6 : vector<8x4x128xbf16> to vector<8x4x128xf32>
    %c64_i32 = arith.constant 64 : i32
    %8 = tpu.dynamic_rotate %7 by %c64_i32 dim 2 : vector<8x4x128xf32>, i32 -> vector<8x4x128xf32>
    %9 = vector.broadcast %2 : vector<8x1x128xf32> to vector<8x4x128xf32>
    %10 = arith.mulf %7, %9 : vector<8x4x128xf32>
    %11 = vector.broadcast %5 : vector<8x1x128xf32> to vector<8x4x128xf32>
    %12 = arith.mulf %8, %11 : vector<8x4x128xf32>
    %13 = arith.addf %10, %12 : vector<8x4x128xf32>
    %14 = arith.truncf %13 : vector<8x4x128xf32> to vector<8x4x128xbf16>
    %c0_6 = arith.constant 0 : index
    %c0_7 = arith.constant 0 : index
    %c0_8 = arith.constant 0 : index
    %15 = vector.load %arg5[%c0_6, %c0_7, %c0_8] : memref<8x4x128xbf16, #tpu.memory_space<vmem>>, vector<8x4x128xbf16>
    tpu.vector_store %arg5[%c0_6, %c0_7, %c0_8], %14 {strides = array<i32>} : memref<8x4x128xbf16, #tpu.memory_space<vmem>>, vector<8x4x128xbf16>,
    %c0_9 = arith.constant 0 : index
    %c0_10 = arith.constant 0 : index
    %c0_11 = arith.constant 0 : index
    %16 = vector.load %arg2[%c0_9, %c0_10, %c0_11] : memref<8x2x128xbf16, #tpu.memory_space<vmem>>, vector<8x2x128xbf16>
    %17 = arith.extf %16 : vector<8x2x128xbf16> to vector<8x2x128xf32>
    %c64_i32_12 = arith.constant 64 : i32
    %18 = tpu.dynamic_rotate %17 by %c64_i32_12 dim 2 : vector<8x2x128xf32>, i32 -> vector<8x2x128xf32>
    %19 = vector.broadcast %2 : vector<8x1x128xf32> to vector<8x2x128xf32>
    %20 = arith.mulf %17, %19 : vector<8x2x128xf32>
    %21 = vector.broadcast %5 : vector<8x1x128xf32> to vector<8x2x128xf32>
    %22 = arith.mulf %18, %21 : vector<8x2x128xf32>
    %23 = arith.addf %20, %22 : vector<8x2x128xf32>
    %24 = arith.truncf %23 : vector<8x2x128xf32> to vector<8x2x128xbf16>
    %c0_13 = arith.constant 0 : index
    %c0_14 = arith.constant 0 : index
    %c0_15 = arith.constant 0 : index
    %25 = vector.load %arg6[%c0_13, %c0_14, %c0_15] : memref<8x2x128xbf16, #tpu.memory_space<vmem>>, vector<8x2x128xbf16>
    tpu.vector_store %arg6[%c0_13, %c0_14, %c0_15], %24 {strides = array<i32>} : memref<8x2x128xbf16, #tpu.memory_space<vmem>>, vector<8x2x128xbf16>,
    return
  }
  func.func @transform_0(%arg0: i32) -> (i32, i32, i32) {
    %c0_i32 = arith.constant 0 : i32
    %c0_i32_0 = arith.constant 0 : i32
    %c0_i32_1 = arith.constant 0 : i32
    return %arg0, %c0_i32, %c0_i32_0 : i32, i32, i32
  }
  func.func @transform_1(%arg0: i32) -> (i32, i32, i32) {
    %c0_i32 = arith.constant 0 : i32
    %c0_i32_0 = arith.constant 0 : i32
    %c0_i32_1 = arith.constant 0 : i32
    return %arg0, %c0_i32, %c0_i32_0 : i32, i32, i32
  }
  func.func @transform_2(%arg0: i32) -> (i32, i32) {
    %c0_i32 = arith.constant 0 : i32
    %c0_i32_0 = arith.constant 0 : i32
    return %arg0, %c0_i32 : i32, i32
  }
  func.func @transform_3(%arg0: i32) -> (i32, i32) {
    %c0_i32 = arith.constant 0 : i32
    %c0_i32_0 = arith.constant 0 : i32
    return %arg0, %c0_i32 : i32, i32
  }
  func.func @transform_4(%arg0: i32) -> (i32, i32, i32) {
    %c0_i32 = arith.constant 0 : i32
    %c0_i32_0 = arith.constant 0 : i32
    %c0_i32_1 = arith.constant 0 : i32
    return %arg0, %c0_i32, %c0_i32_0 : i32, i32, i32
  }
  func.func @transform_5(%arg0: i32) -> (i32, i32, i32) {
    %c0_i32 = arith.constant 0 : i32
    %c0_i32_0 = arith.constant 0 : i32
    %c0_i32_1 = arith.constant 0 : i32
    return %arg0, %c0_i32, %c0_i32_0 : i32, i32, i32
  }
}

</mosaic_0001>

<bundles_post_ra>
// kernel: tpu_custom_call.1
= control target key start
LH: loop header
LB: loop body
LE: loop exit
PB: predicated region body
PF: predicated region fallthrough
CT: control target
= control target key end

     0   :  { %11 = vsyncpa [#allocation3], 0  ;;  %s1651_s0 = inlined_call_operand.hbm [shape: bf16[16,4,128], index: 0, kind: input, shape index: {}, may-alias: {0,4}]   ;;  %s1652_s1 = inlined_call_operand.hbm [shape: bf16[16,2,128], index: 1, kind: input, shape index: {}, may-alias: {1,5}]   ;;  %s1653_s2 = inlined_call_operand.vmem [shape: bf16[16,128], index: 2, kind: input, shape index: {}]   ;;  %s1654_s3 = inlined_call_operand.vmem [shape: bf16[16,128], index: 3, kind: input, shape index: {}]   ;;  %s1655_s4 = inlined_call_operand.hbm [shape: bf16[16,4,128], index: 4, kind: output, shape index: {0}, may-alias: {0,4}]   ;;  %s1656_s5 = inlined_call_operand.hbm [shape: bf16[16,2,128], index: 5, kind: output, shape index: {1}, may-alias: {1,5}]  }
   0x1   :  { %13 = vsyncpa [#allocation3 + $0x1], 0 }
   0x2   :  { %14 = vsyncpa [#allocation6], 0 }
   0x3   :  { %16 = vsyncpa [#allocation6 + $0x1], 0 }
   0x4   :  { %17 = vsyncpa [#allocation4], 0 }
   0x5   :  { %19 = vsyncpa [#allocation4 + $0x1], 0 }
   0x6   :  { %20 = vsyncpa [#allocation9], 0 }
   0x7   :  { %22 = vsyncpa [#allocation9 + $0x1], 0  ;;  %s1189_s18 = smov 0   ;;  %s1191_s19 = smov 0  }
   0x8   :  { %s1193_s20 = smov 0   ;;  %s1195_s21 = smov 0  }
   0x9 LB: > { %s1210_s22 = sadd.s32 4294967295, %s1143_s21   ;;  %s847_s23 = sadd.s32 4294967294, %s1143_s21   ;;  %s1143_s21 = sphi %s1195_s21, %s1672_s21   ;;  %s1139_s20 = sphi %s1193_s20, %s1671_s20   ;;  %s1135_s19 = sphi %s1191_s19, %s1670_s19   ;;  %s1131_s18 = sphi %s1189_s18, %s1669_s18  }
   0xa   : > { %s1214_s24 = sadd.s32 1, %s1143_s21   ;;  %s35_s25 = sadd.s32 1, %s1139_s20 }
   0xb   : > { %s32_s26 = ssub.s32 %s1143_s21, %s1214_s24  ;;  %p42_p0 = scmp.ne.s32.totalorder %s1139_s20, %s1135_s19 }
   0xc   : > { %p33_p1 = scmp.eq.s32.totalorder %s32_s26, 0  ;;  %p43_p2 = scmp.eq.s32.totalorder %s1143_s21, 0 }
   0xd   : > { %p48_p3 = scmp.ne.s32.totalorder %s1135_s19, %s1131_s18  ;;  %p49_p4 = scmp.eq.s32.totalorder %s1210_s22, 0 }
   0xe   : > { %s1226_s27 = scalar_select %p33_p1, %s1139_s20, %s35_s25  }
   0xf   : > { %p1228_p5 = por %p43_p2, %p42_p0  ;;  %p1232_p6 = por %p49_p4, %p48_p3 }
  0x10   : > { %p150_p7 = scmp.eq.s32.totalorder %s1210_s22, 1  ;;  %p156_p8 = scmp.eq.s32.totalorder %s847_s23, 1 }
  0x11   : > { %s1660_s29 = scalar_select %p1232_p6, 1, 0 }
  0x12   : > { %p897_p10 = scmp.lt.s32.totalorder %s1143_s21, 2  ;;  %p1239_p11 = por %p150_p7, %p42_p0 }
  0x13   : > { %p1243_p12 = por %p156_p8, %p48_p3  ;;  %s1248_s7 = sand.u32 1, %s1139_s20  }
  0x14   : > { %s1661_s30 = scalar_select %p1239_p11, 1, 0 }
  0x15   : > { %s1662_s6 = scalar_select %p1243_p12, 1, 0 }
  0x16   : > { %s871_s8 = sshll.u32 %s1143_s21, 8  ;;  %s850_s9 = sshll.u32 %s1248_s7, 4 }
  0x17   : > { %s1255_s12 = scalar_lea.hbm %s1651_s0, %s871_s8  ;;  %s206_s13 = scalar_lea.vmem [#allocation2], %s850_s9 }
  0x18   : > { %s213_s14 = sshll.u32 %s206_s13, 4  ;;  %p1259_p13 = pnand %p897_p10, %p1228_p5  ;;  %s1263_s14 = int_to_ptr.vmem [resolvable:$true] %s213_s14 }
  0x19   : > { %s203_s16 = scalar_lea.sflag [#allocation3], %s1248_s7  ;;  %s981_s17 = scalar_lea.hbm %s1255_s12, 256 }
  0x1a   : > { %p982_p0 = scmp.ne.s32.totalorder %s1255_s12, %s981_s17  ;;  %p983_p1 = pneg %p1259_p13 }
  0x1b   : > { %s986_s26 = scalar_lea.hbm %s1651_s0, 512  ;;  %p987_p4 = scmp.lt.u32.totalorder %s1255_s12, %s1651_s0 }
  0x1c   : > { %p984_p2 = pnand %p983_p1, %p982_p0  ;;  %p988_p5 = scmp.lt.u32.totalorder %s986_s26, %s981_s17 }
  0x1d   : > { %p990_p8 = scmp.lt.u32.totalorder %s981_s17, %s1255_s12 }
  0x1e   : > { %p985_p3 = pneg %p984_p2  ;;  %p989_p7 = por %p988_p5, %p987_p4 }
  0x20   : > { %p991_p10 = por %p990_p8, %p989_p7 }
  0x22   : > { %p992_p9 = pnand %p991_p10, %p985_p3 }
  0x24   : > { %995 = shalt.err (!%p992_p9)
}
  0x25   : > { %s996_s9 = scalar_lea.vmem %s1263_s14, 256  ;;  %s1145_s10 = smov [#allocation2]  }
  0x26   : > { %p997_p0 = scmp.ne.s32.totalorder %s1263_s14, %s996_s9  ;;  %s1001_s11 = sshll.u32 %s1145_s10, 4  ;;  %s1002_s11 = int_to_ptr.vmem [resolvable:$false] %s1001_s11 }
  0x27   : > { %s1003_s13 = scalar_lea.vmem %s1002_s11, 512  ;;  %p1004_p11 = scmp.lt.s32.totalorder %s1263_s14, %s1002_s11 }
  0x28   : > { %p999_p2 = pnand %p997_p0, %p983_p1  ;;  %p1005_p4 = scmp.lt.s32.totalorder %s1003_s13, %s996_s9 }
  0x2a   : > { %p1000_p12 = pneg %p999_p2  ;;  %p1006_p5 = por %p1005_p4, %p1004_p11 }
  0x2c   : > { %p1007_p7 = pnand %p1006_p5, %p1000_p12 }
  0x2e   : > { %1010 = shalt.err (!%p1007_p7)
}
  0x2f   : > { %s1146_s17 = smov 32   ;;  %s1147_s23 = smov 2  }
  0x30   : > { %886 = dma.hbm_to_vmem [thread:$0]  (!%p1259_p13), %s1255_s12, 256, %s1263_s14, %s203_s16, %s1146_s17, %s1146_s17, %s1147_s23  }
  0x31   : > { %p856_p9 = scmp.ge.s32.totalorder %s1143_s21, 1  ;;  %p256_p3 = scmp.lt.s32.totalorder %s1143_s21, 3 }
  0x32   : > { %s853_s25 = sshll.u32 %s1248_s7, 3  ;;  %s872_s28 = sshll.u32 %s1143_s21, 7 }
  0x33   : > { %p1296_p11 = pnand %p856_p9, %p256_p3  ;;  %s227_s8 = scalar_lea.vmem [#allocation5], %s853_s25 }
  0x34   : > { %s234_s9 = sshll.u32 %s227_s8, 4  ;;  %s1304_s13 = scalar_lea.hbm %s1652_s1, %s872_s28  ;;  %s1306_s9 = int_to_ptr.vmem [resolvable:$true] %s234_s9 }
  0x35   : > { %s224_s12 = scalar_lea.sflag [#allocation6], %s1248_s7  ;;  %s1011_s14 = scalar_lea.hbm %s1304_s13, 128 }
  0x36   : > { %p1012_p12 = scmp.ne.s32.totalorder %s1304_s13, %s1011_s14  ;;  %s1016_s23 = scalar_lea.hbm %s1652_s1, 256 }
  0x37   : > { %p1017_p0 = scmp.lt.u32.totalorder %s1304_s13, %s1652_s1  ;;  %p1018_p2 = scmp.lt.u32.totalorder %s1016_s23, %s1011_s14 }
  0x38   : > { %p1014_p8 = pnand %p1012_p12, %p983_p1  ;;  %p1020_p5 = scmp.lt.u32.totalorder %s1011_s14, %s1304_s13 }
  0x39   : > { %p1019_p4 = por %p1018_p2, %p1017_p0 }
  0x3a   : > { %p1015_p10 = pneg %p1014_p8 }
  0x3b   : > { %p1021_p7 = por %p1020_p5, %p1019_p4 }
  0x3d   : > { %p1022_p9 = pnand %p1021_p7, %p1015_p10 }
  0x3f   : > { %1025 = shalt.err (!%p1022_p9)
}
  0x40   : > { %s1026_s8 = scalar_lea.vmem %s1306_s9, 128  ;;  %s1148_s10 = smov [#allocation5]  }
  0x41   : > { %p1027_p3 = scmp.ne.s32.totalorder %s1306_s9, %s1026_s8  ;;  %s1031_s11 = sshll.u32 %s1148_s10, 4  ;;  %s1032_s11 = int_to_ptr.vmem [resolvable:$false] %s1031_s11 }
  0x42   : > { %s1033_s16 = scalar_lea.vmem %s1032_s11, 256  ;;  %p1034_p6 = scmp.lt.s32.totalorder %s1306_s9, %s1032_s11 }
  0x43   : > { %p1029_p12 = pnand %p1027_p3, %p983_p1  ;;  %p1035_p0 = scmp.lt.s32.totalorder %s1033_s16, %s1026_s8 }
  0x45   : > { %p1030_p8 = pneg %p1029_p12  ;;  %p1036_p2 = por %p1035_p0, %p1034_p6 }
  0x47   : > { %p1037_p4 = pnand %p1036_p2, %p1030_p8 }
  0x49   : > { %1040 = shalt.err (!%p1037_p4)
}
  0x4a   : > { %s1149_s14 = smov 16   ;;  %s1150_s17 = smov 1  }
  0x4b   : > { %889 = dma.hbm_to_vmem [thread:$0]  (!%p1259_p13), %s1304_s13, 128, %s1306_s9, %s224_s12, %s1149_s14, %s1149_s14, %s1150_s17  }
  0x4c   : > { %260 = sbr.rel (%p1296_p11) target bundleno = 262 (0x106), region = 36  ;;  %s1337_s23 = sand.u32 (!%p1296_p11), 1, %s1135_s19  }
  0x4d   : > { %s857_s25 = sshll.u32 (!%p1296_p11), %s1337_s23, 4  ;;  %s263_s28 = scalar_lea.sflag (!%p1296_p11), [#allocation3], %s1337_s23 }
  0x4e   : > { %s266_s8 = scalar_lea.vmem (!%p1296_p11), [#allocation2], %s857_s25  ;;  %p1665_p6 = scmp.ne.s32.totalorder (!%p1296_p11), %s1660_s29, 0 }
  0x53   : > { %1114 = dma.done.wait (%p1665_p6), %s263_s28, 256  }
  0x54   : > { %1116 = vsyncadd (%p1665_p6), %s263_s28, 4294967040  ;;  %s858_s7 = sshll.u32 %s1337_s23, 3  ;;  %s272_s15 = scalar_lea.sflag [#allocation6], %s1337_s23 }
  0x55   : > { %s1351_s26 = scalar_lea.vmem [#allocation5], %s858_s7 }
  0x56   : > { %1118 = dma.done.wait (%p1665_p6), %s272_s15, 128  }
  0x57   : > { %1120 = vsyncadd (%p1665_p6), %s272_s15, 4294967168  ;;  %v1357_v0 = vld [vmem:[%s266_s8 + $0x8] sm:$0x3]  ;;  %v1359_v1 = vld [vmem:[%s266_s8 + $0xa] sm:$0x3]  ;;  %s1151_s29 = smov 64   ;;  %v339_v42 = vlaneseq }
  0x58   : > { %v448_v2 = vunpack.c.l.bf16 %v1357_v0  ;;  %v449_v3 = vunpack.c.l.bf16 %v1359_v1  ;;  %v1363_v4 = vld [vmem:[%s266_s8] sm:$0x3]  ;;  %v1365_v5 = vld [vmem:[%s266_s8 + $0x2] sm:$0x3]  ;;  %v1367_v6 = vld [vmem:[%s266_s8 + $0xc] sm:$0x3] }
  0x59   : > { %v444_v7 = vunpack.c.l.bf16 %v1363_v4  ;;  %v445_v8 = vunpack.c.l.bf16 %v1365_v5  ;;  %v1371_v9 = vld [vmem:[%s266_s8 + $0xe] sm:$0x3]  ;;  %v450_v10 = vunpack.c.l.bf16 %v1367_v6  ;;  %v1374_v11 = vld [vmem:[%s266_s8 + $0x4] sm:$0x3]  ;;  %v1376_v12 = vld [vmem:[%s266_s8 + $0x6] sm:$0x3] }
  0x5a   : > { %v951_v13 = vpack.i.bf16 %v449_v3, %v448_v2  ;;  %v451_v14 = vunpack.c.l.bf16 %v1371_v9  ;;  %v1384_v15 = vld [vmem:[%s1351_s26 + $0x2] sm:$0x1]  ;;  %v1387_v16 = vld [vmem:[%s1351_s26 + $0x3] sm:$0x1]  ;;  %v1390_v17 = vld [vmem:[%s1351_s26] sm:$0x1]  ;;  %v446_v19 = vunpack.c.l.bf16 %v1374_v11  ;;  %v447_v20 = vunpack.c.l.bf16 %v1376_v12 }
  0x5b   : > { %v941_v18 = vpack.i.bf16 %v445_v8, %v444_v7  ;;  %v1399_v21 = vld [vmem:[%s1351_s26 + $0x1] sm:$0x1]  ;;  %v598_v23 = vunpack.c.l.bf16 %v1384_v15  ;;  %v599_v25 = vunpack.c.l.bf16 %v1387_v16  ;;  %v596_v26 = vunpack.c.l.bf16 %v1390_v17  ;;  %v1414_v28 = vld [vmem:[%s1351_s26 + $0x6] sm:$0x1]  ;;  %v1417_v29 = vld [vmem:[%s1351_s26 + $0x7] sm:$0x1] }
  0x5c   : > { %952 = vrot.lane.b32.xlu1 %v951_v13, %s1151_s29  ;;  %v956_v22 = vpack.i.bf16 %v451_v14, %v450_v10  ;;  %v946_v24 = vpack.i.bf16 %v447_v20, %v446_v19  ;;  %v597_v27 = vunpack.c.l.bf16 %v1399_v21  ;;  %v1420_v30 = vld [vmem:[%s1351_s26 + $0x4] sm:$0x1]  ;;  %v1423_v31 = vld [vmem:[%s1351_s26 + $0x5] sm:$0x1]  ;;  %v602_v33 = vunpack.c.l.bf16 %v1414_v28  ;;  %p322_p13 = scmp.lt.s32.totalorder %s1210_s22, 1  ;;  %s873_s28 = sshll.u32 %s1210_s22, 8 }
  0x5d   : > { %942 = vrot.lane.b32.xlu0 %v941_v18, %s1151_s29  ;;  %v966_v32 = vpack.i.bf16 %v599_v25, %v598_v23  ;;  %v603_v35 = vunpack.c.l.bf16 %v1417_v29  ;;  %v600_v36 = vunpack.c.l.bf16 %v1420_v30  ;;  %v601_v37 = vunpack.c.l.bf16 %v1423_v31  ;;  %s1542_s8 = scalar_lea.vmem [#allocation7], %s857_s25  ;;  %p1666_p11 = scmp.ne.s32.totalorder %s1661_s30, 0 }
  0x5e   : > { %v961_v34 = vpack.i.bf16 %v597_v27, %v596_v26  ;;  %s323_s9 = scalar_select %p322_p13, %s1210_s22, 1  ;;  %v1152_v40 = vmov 1966171168   ;;  %v340_v45 = vshrl.u32 %v339_v42, 7 }
  0x5f   : > { %v976_v38 = vpack.i.bf16 %v603_v35, %v602_v33  ;;  %v971_v39 = vpack.i.bf16 %v601_v37, %v600_v36  ;;  %v337_v41 = vunpack.c.l.s4 %v1152_v40  ;;  %s679_s15 = sshll.u32 %s1542_s8, 4  ;;  %s1153_s12 = smov [#allocation7]   ;;  %s1555_s15 = int_to_ptr.vmem [resolvable:$true] %s679_s15 }
  0x60   : > { %957 = vrot.lane.b32.xlu1 %v956_v22, %s1151_s29  ;;  %s861_s13 = sshll.u32 %s323_s9, 2  ;;  %v1453_v56 = vsub.s32 0, %v340_v45  ;;  %s661_s9 = scalar_lea.sflag [#allocation4], %s1337_s23 }
  0x61   : > { %947 = vrot.lane.b32.xlu0 %v946_v24, %s1151_s29  ;;  %s325_s11 = scalar_lea.vmem %s1653_s2, %s861_s13  ;;  %v338_v44 = vunpack.c.0.s8 %v337_v41  ;;  %s329_s17 = scalar_lea.vmem %s1654_s3, %s861_s13 }
  0x62   : > { %v332_v43 = vld [vmem:[%s325_s11] sm:$0xf]  ;;  %s1041_s13 = scalar_lea.vmem %s1555_s15, 256  ;;  %s1045_s10 = sshll.u32 %s1153_s12, 4  ;;  %s1046_s10 = int_to_ptr.vmem [resolvable:$false] %s1045_s10 }
  0x63   : > { %v333_v46 = vunpack.c.l.bf16 %v332_v43  ;;  %v341_v47 = vsub.s32 %v338_v44, %v340_v45  ;;  %v384_v49 = vld [vmem:[%s329_s17] sm:$0xf]  ;;  %p1042_p1 = scmp.ne.s32.totalorder %s1555_s15, %s1041_s13  ;;  %s1047_s11 = scalar_lea.vmem %s1046_s10, 512 }
  0x64   : > { %967 = vrot.lane.b32.xlu1 %v966_v32, %s1151_s29  ;;  %v385_v51 = vunpack.c.l.bf16 %v384_v49  ;;  %p1048_p7 = scmp.lt.s32.totalorder %s1555_s15, %s1046_s10  ;;  %p1049_p9 = scmp.lt.s32.totalorder %s1047_s11, %s1041_s13 }
  0x65   : > { %962 = vrot.lane.b32.xlu0 %v961_v34, %s1151_s29  ;;  %v335_v48 = vcombine.high %v333_v46, %v333_v46  ;;  %v342_v52 = vrot.slane %v333_v46, %v341_v47  ;;  %p1043_p10 = pnand %p1042_p1, %p1666_p11 }
  0x66   : > { %v387_v54 = vcombine.high %v385_v51, %v385_v51  ;;  %v394_v62 = vrot.slane %v385_v51, %v341_v47  ;;  %p1050_p3 = por %p1049_p9, %p1048_p7 }
  0x67   : > { %v349_v50 = vrot.slane %v335_v48, %v341_v47  ;;  %v350_v55 = vcombine.high %v342_v52, %v342_v52  ;;  %v358_v59 = vrot.slane %v342_v52, %v341_v47  ;;  %p1044_p5 = pneg %p1043_p10 }
  0x68   : > { %977 = vrot.lane.b32.xlu1 %v976_v38, %s1151_s29  ;;  %v401_v60 = vrot.slane %v387_v54, %v341_v47  ;;  %v402_v40 = vcombine.high %v394_v62, %v394_v62  ;;  %v410_v52 = vrot.slane %v394_v62, %v341_v47 }
  0x69   : > { %972 = vrot.lane.b32.xlu0 %v971_v39, %s1151_s29  ;;  %v351_v53 = vcombine.high %v349_v50, %v349_v50  ;;  %v365_v57 = vrot.slane %v349_v50, %v341_v47  ;;  %v372_v61 = vrot.slane %v350_v55, %v341_v47  ;;  %v380_v18 = vcombine.high %v358_v59, %v358_v59  ;;  %s1553_s29 = scalar_lea.hbm %s1655_s4, %s873_s28  ;;  %p1051_p12 = pnand %p1050_p3, %p1044_p5 }
  0x6a   : > { %v471_v32 = vrot.slane %v358_v59, %v1453_v56  ;;  %v403_v34 = vcombine.high %v401_v60, %v401_v60  ;;  %v417_v48 = vrot.slane %v401_v60, %v341_v47  ;;  %v1504_v12 = vrot.slane %v410_v52, %v1453_v56 }
  0x6b   : > { %v379_v58 = vrot.slane %v351_v53, %v341_v47  ;;  %v381_v63 = vcombine.high %v365_v57, %v365_v57  ;;  %v382_v22 = vcombine.high %v372_v61, %v372_v61  ;;  %v487_v24 = vrot.slane %v365_v57, %v1453_v56 }
  0x6c   : > { %v475_v39 = vrot.slane %v372_v61, %v1453_v56  ;;  %v479_v43 = vrot.slane %v380_v18, %v1453_v56  ;;  %v508_v46 = vmul.f32 %v471_v32, %v444_v7  ;;  %v431_v49 = vrot.slane %v403_v34, %v341_v47 }
  0x6d   : > { %v383_v13 = vcombine.high %v379_v58, %v379_v58  ;;  %v491_v38 = vrot.slane %v379_v58, %v1453_v56  ;;  %v495_v41 = vrot.slane %v381_v63, %v1453_v56  ;;  %v483_v44 = vrot.slane %v382_v22, %v1453_v56 }
  0x6e   : > { %v512_v45 = vmul.f32 %v487_v24, %v448_v2  ;;  %v509_v51 = vmul.f32 %v475_v39, %v445_v8  ;;  %v424_v53 = vrot.slane %v402_v40, %v341_v47  ;;  %v1477_v2 = vmul.f32 %v479_v43, %v446_v19 }
  0x6f   : > { %v499_v42 = vrot.slane %v383_v13, %v1453_v56  ;;  %v513_v50 = vmul.f32 %v491_v38, %v449_v3  ;;  %v514_v54 = vmul.f32 %v495_v41, %v450_v10  ;;  %v1481_v4 = vmul.f32 %v598_v23, %v479_v43 }
  0x70   : > { %v511_v1 = vmul.f32 %v483_v44, %v447_v20  ;;  %v1487_v3 = vmul.f32 %v599_v25, %v483_v44  ;;  %v1491_v5 = vmul.f32 %v596_v26, %v471_v32  ;;  %v1495_v6 = vmul.f32 %v597_v27, %v475_v39 }
  0x71   : > { %v515_v0 = vmul.f32 %v499_v42, %v451_v14  ;;  %v1498_v7 = vrot.slane %v417_v48, %v1453_v56  ;;  %v1501_v8 = vrot.slane %v431_v49, %v1453_v56  ;;  %v433_v9 = vcombine.high %v417_v48, %v417_v48 }
  0x72   : > { %v435_v10 = vcombine.high %v431_v49, %v431_v49  ;;  %v1507_v14 = vrot.slane %v424_v53, %v1453_v56  ;;  %v432_v15 = vcombine.high %v410_v52, %v410_v52  ;;  %v434_v16 = vcombine.high %v424_v53, %v424_v53 }
  0x73   : > { %v1511_v21 = vmul.f32 %v602_v33, %v495_v41  ;;  %v1515_v23 = vmul.f32 %v603_v35, %v499_v42  ;;  %v1519_v27 = vmul.f32 %v600_v36, %v487_v24  ;;  %v1523_v47 = vmul.f32 %v601_v37, %v491_v38 }
  0x74   : > { %v1528_v33 = vrot.slane %v433_v9, %v1453_v56  ;;  %v1531_v29 = vrot.slane %v435_v10, %v1453_v56  ;;  %v527_v57 = vrot.slane %v432_v15, %v1453_v56  ;;  %v531_v31 = vrot.slane %v434_v16, %v1453_v56 }
  0xce   : > { %v953_v11 = vpop.permute.xlu1 %952 }
  0xcf   : > { %v955_v17 = vunpack.i.h.bf16 %v953_v11  ;;  %v954_v19 = vunpack.i.l.bf16 %v953_v11  ;;  %v943_v20 = vpop.permute.xlu0 %942 }
  0xd0   : > { %v945_v25 = vunpack.i.h.bf16 %v943_v20  ;;  %v944_v26 = vunpack.i.l.bf16 %v943_v20 }
  0xd1   : > { %v560_v55 = vmul.f32 %v954_v19, %v1498_v7  ;;  %v561_v28 = vmul.f32 %v955_v17, %v1501_v8 }
  0xd2   : > { %v556_v35 = vmul.f32 %v944_v26, %v1504_v12  ;;  %v557_v30 = vmul.f32 %v945_v25, %v1507_v14  ;;  %v958_v36 = vpop.permute.xlu1 %957 }
  0xd3   : > { %v568_v37 = vadd.f32 %v560_v55, %v512_v45  ;;  %v569_v58 = vadd.f32 %v561_v28, %v513_v50  ;;  %v960_v59 = vunpack.i.h.bf16 %v958_v36  ;;  %v959_v60 = vunpack.i.l.bf16 %v958_v36  ;;  %v948_v61 = vpop.permute.xlu0 %947 }
  0xd4   : > { %v564_v62 = vadd.f32 %v556_v35, %v508_v46  ;;  %v565_v63 = vadd.f32 %v557_v30, %v509_v51  ;;  %v950_v13 = vunpack.i.h.bf16 %v948_v61  ;;  %v949_v18 = vunpack.i.l.bf16 %v948_v61 }
  0xd5   : > { %v576_v22 = vpack.c.bf16 %v568_v37, %v568_v37  ;;  %v577_v24 = vpack.c.bf16 %v569_v58, %v569_v58  ;;  %v562_v32 = vmul.f32 %v959_v60, %v1528_v33  ;;  %v563_v34 = vmul.f32 %v960_v59, %v1531_v29 }
  0xd6   : > { %v572_v38 = vpack.c.bf16 %v564_v62, %v564_v62  ;;  %v573_v39 = vpack.c.bf16 %v565_v63, %v565_v63  ;;  %v558_v56 = vmul.f32 %v949_v18, %v527_v57  ;;  %v559_v40 = vmul.f32 %v950_v13, %v531_v31  ;;  %v968_v41 = vpop.permute.xlu1 %967 }
  0xd7   : > { %584 = vst [vmem:[%s1542_s8 + $0x8] sm:$0x3] %v576_v22  ;;  %585 = vst [vmem:[%s1542_s8 + $0xa] sm:$0x3] %v577_v24  ;;  %v570_v42 = vadd.f32 %v562_v32, %v514_v54  ;;  %v571_v43 = vadd.f32 %v563_v34, %v515_v0  ;;  %v970_v44 = vunpack.i.h.bf16 %v968_v41  ;;  %v969_v45 = vunpack.i.l.bf16 %v968_v41  ;;  %v963_v46 = vpop.permute.xlu0 %962 }
  0xd8   : > { %580 = vst [vmem:[%s1542_s8] sm:$0x3] %v572_v38  ;;  %581 = vst [vmem:[%s1542_s8 + $0x2] sm:$0x3] %v573_v39  ;;  %v566_v48 = vadd.f32 %v558_v56, %v1477_v2  ;;  %v567_v49 = vadd.f32 %v559_v40, %v511_v1  ;;  %v965_v50 = vunpack.i.h.bf16 %v963_v46  ;;  %v964_v51 = vunpack.i.l.bf16 %v963_v46 }
  0xd9   : > { %v578_v52 = vpack.c.bf16 %v570_v42, %v570_v42  ;;  %v579_v53 = vpack.c.bf16 %v571_v43, %v571_v43  ;;  %v630_v9 = vmul.f32 %v969_v45, %v527_v57  ;;  %v631_v10 = vmul.f32 %v970_v44, %v531_v31 }
  0xda   : > { %v574_v54 = vpack.c.bf16 %v566_v48, %v566_v48  ;;  %v575_v0 = vpack.c.bf16 %v567_v49, %v567_v49  ;;  %v628_v2 = vmul.f32 %v964_v51, %v1504_v12  ;;  %v629_v1 = vmul.f32 %v965_v50, %v1507_v14  ;;  %v978_v11 = vpop.permute.xlu1 %977 }
  0xdb   : > { %586 = vst [vmem:[%s1542_s8 + $0xc] sm:$0x3] %v578_v52  ;;  %587 = vst [vmem:[%s1542_s8 + $0xe] sm:$0x3] %v579_v53  ;;  %v638_v15 = vadd.f32 %v630_v9, %v1481_v4  ;;  %v639_v16 = vadd.f32 %v631_v10, %v1487_v3  ;;  %v980_v17 = vunpack.i.h.bf16 %v978_v11  ;;  %v979_v19 = vunpack.i.l.bf16 %v978_v11  ;;  %v973_v20 = vpop.permute.xlu0 %972 }
  0xdc   : > { %582 = vst [vmem:[%s1542_s8 + $0x4] sm:$0x3] %v574_v54  ;;  %583 = vst [vmem:[%s1542_s8 + $0x6] sm:$0x3] %v575_v0  ;;  %v636_v12 = vadd.f32 %v628_v2, %v1491_v5  ;;  %v637_v14 = vadd.f32 %v629_v1, %v1495_v6  ;;  %v975_v25 = vunpack.i.h.bf16 %v973_v20  ;;  %v974_v26 = vunpack.i.l.bf16 %v973_v20 }
  0xdd   : > { %v646_v55 = vpack.c.bf16 %v638_v15, %v638_v15  ;;  %v647_v28 = vpack.c.bf16 %v639_v16, %v639_v16  ;;  %v634_v4 = vmul.f32 %v979_v19, %v1528_v33  ;;  %v635_v3 = vmul.f32 %v980_v17, %v1531_v29 }
  0xde   : > { %1054 = shalt.err (!%p1051_p12)
}
  0xdf   : > { %s1055_s16 = scalar_lea.hbm %s1553_s29, 256  ;;  %s1059_s28 = scalar_lea.hbm %s1655_s4, 512 }
  0xe0   : > { %p1056_p8 = scmp.ne.s32.totalorder %s1553_s29, %s1055_s16  ;;  %p1060_p4 = scmp.lt.u32.totalorder %s1553_s29, %s1655_s4 }
  0xe1   : > { %p1061_p6 = scmp.lt.u32.totalorder %s1059_s28, %s1055_s16  ;;  %p1063_p1 = scmp.lt.u32.totalorder %s1055_s16, %s1553_s29 }
  0xe2   : > { %p1057_p0 = pnand %p1056_p8, %p1666_p11 }
  0xe3   : > { %p1062_p13 = por %p1061_p6, %p1060_p4 }
  0xe4   : > { %p1058_p2 = pneg %p1057_p0 }
  0xe5   : > { %p1064_p10 = por %p1063_p1, %p1062_p13 }
  0xe7   : > { %p1065_p5 = pnand %p1064_p10, %p1058_p2 }
  0xe9   : > { %1068 = shalt.err (!%p1065_p5)
}
  0xea   : > { %s1154_s26 = smov 32   ;;  %s1155_s13 = smov 2   ;;  %v644_v5 = vpack.c.bf16 %v636_v12, %v636_v12  ;;  %v645_v6 = vpack.c.bf16 %v637_v14, %v637_v14  ;;  %v632_v33 = vmul.f32 %v974_v26, %v1498_v7  ;;  %v633_v29 = vmul.f32 %v975_v25, %v1501_v8 }
  0xeb   : > { %879 = dma.vmem_to_hbm [thread:$0]  (%p1666_p11), %s1555_s15, 256, %s1553_s29, %s661_s9, %s1154_s26, %s1154_s26, %s1155_s13   ;;  %v642_v35 = vadd.f32 %v634_v4, %v1511_v21  ;;  %v643_v30 = vadd.f32 %v635_v3, %v1515_v23 }
  0xec   : > { %s874_s12 = sshll.u32 %s1210_s22, 7  ;;  %s319_s10 = scalar_lea.vmem [#allocation8], %s858_s7  ;;  %v640_v36 = vadd.f32 %v632_v33, %v1519_v27  ;;  %v641_v7 = vadd.f32 %v633_v29, %v1523_v47 }
  0xed   : > { %s695_s11 = sshll.u32 %s319_s10, 4  ;;  %654 = vst [vmem:[%s319_s10 + $0x2] sm:$0x1] %v646_v55  ;;  %655 = vst [vmem:[%s319_s10 + $0x3] sm:$0x1] %v647_v28  ;;  %v650_v57 = vpack.c.bf16 %v642_v35, %v642_v35  ;;  %v651_v8 = vpack.c.bf16 %v643_v30, %v643_v30  ;;  %s1605_s7 = scalar_lea.hbm %s1656_s5, %s874_s12  ;;  %s1607_s11 = int_to_ptr.vmem [resolvable:$true] %s695_s11 }
  0xee   : > { %652 = vst [vmem:[%s319_s10] sm:$0x1] %v644_v5  ;;  %653 = vst [vmem:[%s319_s10 + $0x1] sm:$0x1] %v645_v6  ;;  %v648_v21 = vpack.c.bf16 %v640_v36, %v640_v36  ;;  %v649_v23 = vpack.c.bf16 %v641_v7, %v641_v7  ;;  %s666_s29 = scalar_lea.sflag [#allocation9], %s1337_s23  ;;  %s1069_s9 = scalar_lea.vmem %s1607_s11, 128 }
  0xef   : > { %658 = vst [vmem:[%s319_s10 + $0x6] sm:$0x1] %v650_v57  ;;  %659 = vst [vmem:[%s319_s10 + $0x7] sm:$0x1] %v651_v8  ;;  %p1070_p7 = scmp.ne.s32.totalorder %s1607_s11, %s1069_s9  ;;  %s1156_s16 = smov [#allocation8]  }
  0xf0   : > { %656 = vst [vmem:[%s319_s10 + $0x4] sm:$0x1] %v648_v21  ;;  %657 = vst [vmem:[%s319_s10 + $0x5] sm:$0x1] %v649_v23  ;;  %s1073_s14 = sshll.u32 %s1156_s16, 4  ;;  %s1074_s14 = int_to_ptr.vmem [resolvable:$false] %s1073_s14 }
  0xf1   : > { %p1071_p9 = pnand %p1070_p7, %p1666_p11  ;;  %s1075_s17 = scalar_lea.vmem %s1074_s14, 256 }
  0xf2   : > { %p1076_p12 = scmp.lt.s32.totalorder %s1607_s11, %s1074_s14  ;;  %p1077_p8 = scmp.lt.s32.totalorder %s1075_s17, %s1069_s9 }
  0xf3   : > { %p1072_p3 = pneg %p1071_p9 }
  0xf4   : > { %p1078_p0 = por %p1077_p8, %p1076_p12 }
  0xf6   : > { %p1079_p2 = pnand %p1078_p0, %p1072_p3 }
  0xf8   : > { %1082 = shalt.err (!%p1079_p2)
}
  0xf9   : > { %s1083_s28 = scalar_lea.hbm %s1605_s7, 128  ;;  %s1087_s26 = scalar_lea.hbm %s1656_s5, 256 }
  0xfa   : > { %p1084_p4 = scmp.ne.s32.totalorder %s1605_s7, %s1083_s28  ;;  %p1088_p1 = scmp.lt.u32.totalorder %s1605_s7, %s1656_s5 }
  0xfb   : > { %p1089_p10 = scmp.lt.u32.totalorder %s1087_s26, %s1083_s28  ;;  %p1091_p7 = scmp.lt.u32.totalorder %s1083_s28, %s1605_s7 }
  0xfc   : > { %p1085_p6 = pnand %p1084_p4, %p1666_p11 }
  0xfd   : > { %p1090_p5 = por %p1089_p10, %p1088_p1 }
  0xfe   : > { %p1086_p13 = pneg %p1085_p6 }
  0xff   : > { %p1092_p9 = por %p1091_p7, %p1090_p5 }
 0x101   : > { %p1093_p3 = pnand %p1092_p9, %p1086_p13 }
 0x103   : > { %1096 = shalt.err (!%p1093_p3)
}
 0x104   : > { %s1157_s10 = smov 16   ;;  %s1158_s22 = smov 1  }
 0x105   : > { %880 = dma.vmem_to_hbm [thread:$0]  (%p1666_p11), %s1607_s11, 128, %s1605_s7, %s666_s29, %s1157_s10, %s1157_s10, %s1158_s22  }
 0x106 PF: > { %s710_s15 = sand.u32 1, %s1131_s18   ;;  %p1667_p12 = scmp.ne.s32.totalorder %s1662_s6, 0 }
 0x107   : > { %p1668_p8 = scmp.ge.s32.totalorder %s1143_s21, 2  ;;  %s711_s9 = scalar_lea.sflag [#allocation4], %s710_s15 }
 0x109   : > { %p891_p0 = pnand %p1668_p8, %p1667_p12 }
 0x10b   : > { %1122 = dma.done.wait (!%p891_p0), %s711_s9, 256  }
 0x10c   : > { %1124 = vsyncadd (!%p891_p0), %s711_s9, 4294967040  ;;  %s720_s16 = scalar_lea.sflag [#allocation9], %s710_s15 }
 0x10d   : > { %1126 = dma.done.wait (!%p891_p0), %s720_s16, 128  }
 0x10e   : > { %1128 = vsyncadd (!%p891_p0), %s720_s16, 4294967168  ;;  %p25_p11 = scmp.ge.s32.totalorder %s1214_s24, 4   ;;  %s1669_s18 = smov %s1135_s19 }
 0x10f   : > { %s1670_s19 = smov %s1139_s20  ;;  %s1671_s20 = smov %s1226_s27 }
 0x110   : > { %s1672_s21 = smov %s1214_s24  ;;  %27 = sbr.rel (!%p25_p11) target bundleno = 9 (0x9), region = 117 }
 0x117   :  { %725 = vsyncpa [#allocation3], 1 }
 0x118   :  { %727 = vsyncpa [#allocation3 + $0x1], 1 }
 0x119   :  { %728 = vsyncpa [#allocation6], 1 }
 0x11a   :  { %730 = vsyncpa [#allocation6 + $0x1], 1 }
 0x11b   :  { %731 = vsyncpa [#allocation4], 1 }
 0x11c   :  { %733 = vsyncpa [#allocation4 + $0x1], 1 }
 0x11d   :  { %734 = vsyncpa [#allocation9], 1 }
 0x11e   :  { %736 = vsyncpa [#allocation9 + $0x1], 1 }

</bundles_post_ra>
